<compile_context>
chip_gen: v6e
topology: v6e:2x2x1
jax: 0.10.0
libtpu: 0.0.40
codegen_flags: <defaults>
</compile_context>

<pallas_src>
import jax
import jax.numpy as jnp
from jax.experimental import pallas as pl
from jax.experimental.pallas import tpu as pltpu  # noqa: F401  (TPU backend)

LANE = 128  # lane-dense padding width for kernel outputs


# ---------------------------------------------------------------------------
# Pallas kernel: whole forward pass in one call
# ---------------------------------------------------------------------------
def fused_mlp_kernel(x_ref, w1_ref, b1_ref, w2_ref, b2_ref, wh_ref, bh_ref,
                     hn_ref, y_ref):
    """h1 = relu(x @ W1 + b1)
       h2 = relu(h1 @ W2p + b2p)          (W2p zero-padded to 128 lanes)
       y  = h2 @ Wh + bh                  (all task heads, zero-padded)
       hn = h2 * rsqrt(max(sum(h2^2), eps^2))   == F.normalize(h2, dim=1)
    MXU matmuls take bf16 operands with f32 accumulation; everything
    elementwise stays f32."""
    # fc1 + ReLU
    h1 = jnp.dot(x_ref[...], w1_ref[...],
                 preferred_element_type=jnp.float32) + b1_ref[...]
    h1 = jnp.maximum(h1, 0.0)

    # fc2 + ReLU (output padded to LANE columns; padded columns are exactly 0)
    h2 = jnp.dot(h1.astype(jnp.bfloat16), w2_ref[...],
                 preferred_element_type=jnp.float32) + b2_ref[...]
    h2 = jnp.maximum(h2, 0.0)

    # all task heads in a single MXU push (zero rows/cols keep logits exact)
    y_ref[...] = jnp.dot(h2.astype(jnp.bfloat16), wh_ref[...],
                         preferred_element_type=jnp.float32) + bh_ref[...]

    # F.normalize(h, dim=1): clamp(||h||, 1e-12) == rsqrt(max(sumsq, 1e-24))
    sumsq = jnp.sum(h2 * h2, axis=1, keepdims=True)
    hn_ref[...] = h2 * jax.lax.rsqrt(jnp.maximum(sumsq, 1e-24))


# ---------------------------------------------------------------------------
# Wrappers
# ---------------------------------------------------------------------------
def _full_spec(shape):
    # Full-array block (block dims equal the array dims -> satisfies the
    # (8,128) constraint via the full-extent exemption). Gridless call.
    return pl.BlockSpec(shape, lambda: tuple(0 for _ in shape))


def fused_mlp(x_bf16, w1, b1, w2, b2, wh, bh):
    B, D = x_bf16.shape
    H = w1.shape[1]
    HPAD = w2.shape[1]
    NPAD = wh.shape[1]

    flops = 2 * B * D * H + 2 * B * H * HPAD + 2 * B * HPAD * NPAD
    bytes_accessed = (
        x_bf16.size * 2 + w1.size * 2 + w2.size * 2 + wh.size * 2
        + b1.size * 4 + b2.size * 4 + bh.size * 4
        + B * HPAD * 4 + B * NPAD * 4
    )

    return pl.pallas_call(
        fused_mlp_kernel,
        out_shape=(
            jax.ShapeDtypeStruct((B, HPAD), jnp.float32),  # normalized rep
            jax.ShapeDtypeStruct((B, NPAD), jnp.float32),  # concat logits
        ),
        in_specs=[
            _full_spec((B, D)),
            _full_spec((D, H)),
            _full_spec((1, H)),
            _full_spec((H, HPAD)),
            _full_spec((1, HPAD)),
            _full_spec((HPAD, NPAD)),
            _full_spec((1, NPAD)),
        ],
        out_specs=(
            _full_spec((B, HPAD)),
            _full_spec((B, NPAD)),
        ),
        cost_estimate=pl.CostEstimate(
            flops=flops, transcendentals=B, bytes_accessed=bytes_accessed),
    )(x_bf16, w1, b1, w2, b2, wh, bh)


def pack_params(params, taskcla, lane=LANE):
    """One-time packing: concat heads, zero-pad to lane-dense widths, cast
    MXU operands to bf16. Zero padding keeps results bit-exact."""
    H = params["w1"].shape[1]
    sizes = [n for _, n in taskcla]
    offsets, off = [], 0
    for n in sizes:
        offsets.append(off)
        off += n
    tn = off
    assert H <= lane and tn <= lane

    wh = jnp.concatenate([params["last_w"][t] for t, _ in taskcla], axis=1)
    bh = jnp.concatenate([params["last_b"][t] for t, _ in taskcla], axis=1)

    wh_pad = jnp.zeros((lane, lane), jnp.float32).at[:H, :tn].set(wh)
    bh_pad = jnp.zeros((1, lane), jnp.float32).at[:, :tn].set(bh)
    w2_pad = jnp.zeros((H, lane), jnp.float32).at[:, :H].set(params["w2"])
    b2_pad = jnp.zeros((1, lane), jnp.float32).at[:, :H].set(params["b2"])

    return {
        "w1": params["w1"].astype(jnp.bfloat16),
        "b1": params["b1"],
        "w2": w2_pad.astype(jnp.bfloat16),
        "b2": b2_pad,
        "wh": wh_pad.astype(jnp.bfloat16),
        "bh": bh_pad,
        "nhid": H,
        "head_offsets": offsets,
        "head_sizes": sizes,
    }


def net_forward(x, packed, taskcla):
    """Reproduces Net.forward for the 'til' scenario.

    x: [B, C, H, W] (NCHW, like PyTorch). Returns dict with 'y' (list of
    per-task logits), 'normalized_pooled_rep', 'masks' (None)."""
    B = x.shape[0]
    x_flat = x.reshape(B, -1).astype(jnp.bfloat16)  # torch .view(B, -1)

    hn_pad, y_pad = fused_mlp(x_flat, packed["w1"], packed["b1"],
                              packed["w2"], packed["b2"],
                              packed["wh"], packed["bh"])

    H = packed["nhid"]
    y = []
    for (t, n), off in zip(taskcla, packed["head_offsets"]):
        y.append(y_pad[:, off:off + n])

    return {"y": y, "normalized_pooled_rep": hn_pad[:, :H], "masks": None}


# ---------------------------------------------------------------------------
# Deterministic parameter init (mimics torch.nn.Linear default init)
# ---------------------------------------------------------------------------
def init_params(key, in_dim, nhid, taskcla):
    def linear_init(k, fan_in, fan_out):
        kw, kb = jax.random.split(k)
        bound = 1.0 / jnp.sqrt(fan_in)
        # stored as [in, out] (transposed vs torch's [out, in])
        w = jax.random.uniform(kw, (fan_in, fan_out), jnp.float32, -bound, bound)
        b = jax.random.uniform(kb, (1, fan_out), jnp.float32, -bound, bound)
        return w, b

    keys = jax.random.split(key, 2 + len(taskcla))
    w1, b1 = linear_init(keys[0], in_dim, nhid)
    w2, b2 = linear_init(keys[1], nhid, nhid)
    last_w, last_b = [], []
    for i, (_t, n) in enumerate(taskcla):
        w, b = linear_init(keys[2 + i], nhid, n)
        last_w.append(w)
        last_b.append(b)
    return {"w1": w1, "b1": b1, "w2": w2, "b2": b2,
            "last_w": last_w, "last_b": last_b}


# ---------------------------------------------------------------------------
if __name__ == "__main__":
    # Small shapes consistent with the module:
    #   args.image_channel = 4, args.image_size = 16, args.mlp_adapter_size = 32
    #   scenario = 'til', taskcla = [(0, 5), (1, 5)]
    B, C, S = 2, 4, 16
    NHID = 32
    taskcla = [(0, 5), (1, 5)]
    in_dim = C * S * S

    key = jax.random.PRNGKey(0)
    k_x, k_p = jax.random.split(key)
    x = jax.random.normal(k_x, (B, C, S, S), jnp.float32)
    params = init_params(k_p, in_dim, NHID, taskcla)
    packed = pack_params(params, taskcla)

    out = net_forward(x, packed, taskcla)
    jax.block_until_ready(out["normalized_pooled_rep"])
    for yt in out["y"]:
        jax.block_until_ready(yt)

    # sanity: plain-JAX reference using the same bf16-operand / f32-accumulate
    # matmul recipe as the kernel (padding is exact zero, so it cancels out).
    xf = x.reshape(B, -1)
    h1 = jnp.maximum(
        jnp.dot(xf.astype(jnp.bfloat16), params["w1"].astype(jnp.bfloat16),
                preferred_element_type=jnp.float32) + params["b1"], 0.0)
    h2 = jnp.maximum(
        jnp.dot(h1.astype(jnp.bfloat16), params["w2"].astype(jnp.bfloat16),
                preferred_element_type=jnp.float32) + params["b2"], 0.0)
    hn_ref = h2 / jnp.maximum(
        jnp.sqrt(jnp.sum(h2 * h2, axis=1, keepdims=True)), 1e-12)
    assert out["normalized_pooled_rep"].shape == (B, NHID)
    assert jnp.allclose(out["normalized_pooled_rep"], hn_ref,
                        atol=2e-3, rtol=2e-3)
    for t, n in taskcla:
        y_ref = (jnp.dot(h2.astype(jnp.bfloat16),
                         params["last_w"][t].astype(jnp.bfloat16),
                         preferred_element_type=jnp.float32)
                 + params["last_b"][t])
        assert out["y"][t].shape == (B, n)
        assert jnp.allclose(out["y"][t], y_ref, atol=2e-3, rtol=2e-3)

    print("KERNEL_OK")
</pallas_src>

<mosaic_0001>
module attributes {stable_mosaic.version = 11 : i64} {
  func.func @fused_mlp_kernel(%arg0: memref<2x1024xbf16, #tpu.memory_space<vmem>>, %arg1: memref<1024x32xbf16, #tpu.memory_space<vmem>>, %arg2: memref<1x32xf32, #tpu.memory_space<vmem>>, %arg3: memref<32x128xbf16, #tpu.memory_space<vmem>>, %arg4: memref<1x128xf32, #tpu.memory_space<vmem>>, %arg5: memref<128x128xbf16, #tpu.memory_space<vmem>>, %arg6: memref<1x128xf32, #tpu.memory_space<vmem>>, %arg7: memref<2x128xf32, #tpu.memory_space<vmem>>, %arg8: memref<2x128xf32, #tpu.memory_space<vmem>>) attributes {dimension_semantics = [], scalar_prefetch = 0 : i64, scratch_operands = 0 : i64, tpu.core_type = #tpu.core_type<tc>} {
    %c0 = arith.constant 0 : index
    %c0_0 = arith.constant 0 : index
    %0 = vector.load %arg0[%c0, %c0_0] : memref<2x1024xbf16, #tpu.memory_space<vmem>>, vector<2x1024xbf16>
    %c0_1 = arith.constant 0 : index
    %c0_2 = arith.constant 0 : index
    %1 = vector.load %arg1[%c0_1, %c0_2] : memref<1024x32xbf16, #tpu.memory_space<vmem>>, vector<1024x32xbf16>
    %cst = arith.constant dense<0.000000e+00> : vector<2x32xf32>
    %2 = tpu.matmul %0, %1, %cst {dimension_numbers = #tpu.dot_dimension_numbers<[1], [0], [0], [1], [0, 0, 1, 1], [], []>} : vector<2x1024xbf16>, vector<1024x32xbf16>, vector<2x32xf32> -> vector<2x32xf32>
    %c0_3 = arith.constant 0 : index
    %c0_4 = arith.constant 0 : index
    %3 = vector.load %arg2[%c0_3, %c0_4] : memref<1x32xf32, #tpu.memory_space<vmem>>, vector<1x32xf32>
    %4 = vector.broadcast %3 : vector<1x32xf32> to vector<2x32xf32>
    %5 = arith.addf %2, %4 : vector<2x32xf32>
    %cst_5 = arith.constant 0.000000e+00 : f32
    %6 = vector.broadcast %cst_5 : f32 to vector<2x32xf32>
    %7 = arith.maximumf %5, %6 : vector<2x32xf32>
    %8 = arith.truncf %7 : vector<2x32xf32> to vector<2x32xbf16>
    %c0_6 = arith.constant 0 : index
    %c0_7 = arith.constant 0 : index
    %9 = vector.load %arg3[%c0_6, %c0_7] : memref<32x128xbf16, #tpu.memory_space<vmem>>, vector<32x128xbf16>
    %cst_8 = arith.constant dense<0.000000e+00> : vector<2x128xf32>
    %10 = tpu.matmul %8, %9, %cst_8 {dimension_numbers = #tpu.dot_dimension_numbers<[1], [0], [0], [1], [0, 0, 1, 1], [], []>} : vector<2x32xbf16>, vector<32x128xbf16>, vector<2x128xf32> -> vector<2x128xf32>
    %c0_9 = arith.constant 0 : index
    %c0_10 = arith.constant 0 : index
    %11 = vector.load %arg4[%c0_9, %c0_10] : memref<1x128xf32, #tpu.memory_space<vmem>>, vector<1x128xf32>
    %12 = vector.broadcast %11 : vector<1x128xf32> to vector<2x128xf32>
    %13 = arith.addf %10, %12 : vector<2x128xf32>
    %cst_11 = arith.constant 0.000000e+00 : f32
    %14 = vector.broadcast %cst_11 : f32 to vector<2x128xf32>
    %15 = arith.maximumf %13, %14 : vector<2x128xf32>
    %16 = arith.truncf %15 : vector<2x128xf32> to vector<2x128xbf16>
    %c0_12 = arith.constant 0 : index
    %c0_13 = arith.constant 0 : index
    %17 = vector.load %arg5[%c0_12, %c0_13] : memref<128x128xbf16, #tpu.memory_space<vmem>>, vector<128x128xbf16>
    %cst_14 = arith.constant dense<0.000000e+00> : vector<2x128xf32>
    %18 = tpu.matmul %16, %17, %cst_14 {dimension_numbers = #tpu.dot_dimension_numbers<[1], [0], [0], [1], [0, 0, 1, 1], [], []>} : vector<2x128xbf16>, vector<128x128xbf16>, vector<2x128xf32> -> vector<2x128xf32>
    %c0_15 = arith.constant 0 : index
    %c0_16 = arith.constant 0 : index
    %19 = vector.load %arg6[%c0_15, %c0_16] : memref<1x128xf32, #tpu.memory_space<vmem>>, vector<1x128xf32>
    %20 = vector.broadcast %19 : vector<1x128xf32> to vector<2x128xf32>
    %21 = arith.addf %18, %20 : vector<2x128xf32>
    %c0_17 = arith.constant 0 : index
    %c0_18 = arith.constant 0 : index
    %22 = vector.load %arg8[%c0_17, %c0_18] : memref<2x128xf32, #tpu.memory_space<vmem>>, vector<2x128xf32>
    tpu.vector_store %arg8[%c0_17, %c0_18], %21 {strides = array<i32>} : memref<2x128xf32, #tpu.memory_space<vmem>>, vector<2x128xf32>,
    %23 = arith.mulf %15, %15 : vector<2x128xf32>
    %cst_19 = arith.constant dense<0.000000e+00> : vector<2xf32>
    %24 = vector.multi_reduction <add>, %23, %cst_19 [1] : vector<2x128xf32> to vector<2xf32>
    %25 = vector.shape_cast %24 : vector<2xf32> to vector<2x1xf32>
    %cst_20 = arith.constant 1.000000e-24 : f32
    %26 = vector.broadcast %cst_20 : f32 to vector<2x1xf32>
    %27 = arith.maximumf %25, %26 : vector<2x1xf32>
    %28 = math.rsqrt %27 : vector<2x1xf32>
    %29 = vector.broadcast %28 : vector<2x1xf32> to vector<2x128xf32>
    %30 = arith.mulf %15, %29 : vector<2x128xf32>
    %c0_21 = arith.constant 0 : index
    %c0_22 = arith.constant 0 : index
    %31 = vector.load %arg7[%c0_21, %c0_22] : memref<2x128xf32, #tpu.memory_space<vmem>>, vector<2x128xf32>
    tpu.vector_store %arg7[%c0_21, %c0_22], %30 {strides = array<i32>} : memref<2x128xf32, #tpu.memory_space<vmem>>, vector<2x128xf32>,
    return
  }
}

</mosaic_0001>

<bundles_post_ra>
// kernel: tpu_custom_call.1
= control target key start
LH: loop header
LB: loop body
LE: loop exit
PB: predicated region body
PF: predicated region fallthrough
CT: control target
= control target key end

     0   :  { %14 = vsyncpa [#allocation3], 0  ;;  %v172_v28 = vlaneseq  ;;  %v1321_v36 = vmov 1966171168   ;;  %s1624_s0 = inlined_call_operand.vmem [shape: bf16[2,1024], index: 0, kind: input, shape index: {}]   ;;  %s1625_s1 = inlined_call_operand.vmem [shape: bf16[1024,32], index: 1, kind: input, shape index: {}]   ;;  %s1626_s2 = inlined_call_operand.vmem [shape: f32[1,32], index: 2, kind: input, shape index: {}]   ;;  %s1627_s3 = inlined_call_operand.vmem [shape: bf16[32,128], index: 3, kind: input, shape index: {}]   ;;  %s1628_s4 = inlined_call_operand.vmem [shape: f32[1,128], index: 4, kind: input, shape index: {}]   ;;  %s1629_s5 = inlined_call_operand.vmem [shape: bf16[128,128], index: 5, kind: input, shape index: {}]   ;;  %s1630_s6 = inlined_call_operand.vmem [shape: f32[1,128], index: 6, kind: input, shape index: {}]   ;;  %s1631_s7 = inlined_call_operand.hbm [shape: f32[2,128], index: 7, kind: output, shape index: {0}]   ;;  %s1632_s8 = inlined_call_operand.hbm [shape: f32[2,128], index: 8, kind: output, shape index: {1}]  }
   0x1   :  { %v1200_v0 = vld [vmem:[%s1625_s1 + $0x78] sm:$0xff]   ;;  %v1204_v4 = vld [vmem:[%s1625_s1 + $0x70] sm:$0xff]   ;;  %v1208_v8 = vld [vmem:[%s1625_s1 + $0x68] sm:$0xff]   ;;  %v170_v37 = vunpack.c.l.s4 %v1321_v36 }
   0x2   :  { %v1201_v1 = vld [vmem:[%s1625_s1 + $0xf8] sm:$0xff]   ;;  %1067 = vmatprep.subr.bf16.mxu0 %v1200_v0  ;;  %v1205_v5 = vld [vmem:[%s1625_s1 + $0xf0] sm:$0xff]   ;;  %v1209_v9 = vld [vmem:[%s1625_s1 + $0xe8] sm:$0xff]   ;;  %v173_v33 = vshrl.u32 %v172_v28, 7 }
   0x3   :  { %v1202_v2 = vld [vmem:[%s1625_s1 + $0x38] sm:$0xff]   ;;  %1089 = vmatprep.subr.bf16.mxu1 %v1201_v1  ;;  %v1206_v6 = vld [vmem:[%s1625_s1 + $0x30] sm:$0xff]   ;;  %v1210_v10 = vld [vmem:[%s1625_s1 + $0x28] sm:$0xff]   ;;  %v171_v40 = vunpack.c.0.s8 %v170_v37 }
   0x4   :  { %v1203_v3 = vld [vmem:[%s1625_s1 + $0xb8] sm:$0xff]   ;;  %1068 = vmatpush3.bf16.msra.mxu0 %v1202_v2  ;;  %v1207_v7 = vld [vmem:[%s1625_s1 + $0xb0] sm:$0xff]   ;;  %v1211_v11 = vld [vmem:[%s1625_s1 + $0xa8] sm:$0xff]  }
   0x5   :  { %1090 = vmatpush3.bf16.msra.mxu1 %v1203_v3  ;;  %1069 = vmatprep.subr.bf16.mxu0 %v1204_v4  ;;  %v1212_v12 = vld [vmem:[%s1625_s1 + $0x60] sm:$0xff]   ;;  %v1216_v16 = vld [vmem:[%s1625_s1 + $0x58] sm:$0xff]   ;;  %v1220_v20 = vld [vmem:[%s1625_s1 + $0x50] sm:$0xff]   ;;  %v1476_v41 = vsub.s32 %v171_v40, %v173_v33 }
   0x6   :  { %1091 = vmatprep.subr.bf16.mxu1 %v1205_v5  ;;  %v1213_v13 = vld [vmem:[%s1625_s1 + $0xe0] sm:$0xff]   ;;  %v1217_v17 = vld [vmem:[%s1625_s1 + $0xd8] sm:$0xff]   ;;  %v1221_v21 = vld [vmem:[%s1625_s1 + $0xd0] sm:$0xff]  }
   0x7   :  { %v1214_v14 = vld [vmem:[%s1625_s1 + $0x20] sm:$0xff]   ;;  %v1218_v18 = vld [vmem:[%s1625_s1 + $0x18] sm:$0xff]   ;;  %v1222_v22 = vld [vmem:[%s1625_s1 + $0x10] sm:$0xff]  }
   0x8   :  { %1070 = vmatpush3.bf16.msra.mxu0 %v1206_v6  ;;  %v1215_v15 = vld [vmem:[%s1625_s1 + $0xa0] sm:$0xff]   ;;  %v1219_v19 = vld [vmem:[%s1625_s1 + $0x98] sm:$0xff]   ;;  %v1223_v23 = vld [vmem:[%s1625_s1 + $0x90] sm:$0xff]  }
   0x9   :  { %1092 = vmatpush3.bf16.msra.mxu1 %v1207_v7  ;;  %1071 = vmatprep.subr.bf16.mxu0 %v1208_v8  ;;  %v1224_v24 = vld [vmem:[%s1625_s1 + $0x48] sm:$0xff]   ;;  %v1228_v29 = vld [vmem:[%s1625_s1 + $0x40] sm:$0xff]   ;;  %v1233_v35 = vld [vmem:[%s1625_s1 + $0x178] sm:$0xff]  }
   0xa   :  { %1093 = vmatprep.subr.bf16.mxu1 %v1209_v9  ;;  %v1225_v25 = vld [vmem:[%s1625_s1 + $0xc8] sm:$0xff]   ;;  %v1229_v30 = vld [vmem:[%s1625_s1 + $0xc0] sm:$0xff]   ;;  %v1234_v38 = vld [vmem:[%s1625_s1 + $0x1f8] sm:$0xff]  }
   0xb   :  { %v1226_v26 = vld [vmem:[%s1625_s1 + $0x8] sm:$0xff]   ;;  %v1230_v31 = vld [vmem:[%s1625_s1] sm:$0xff]   ;;  %v1235_v47 = vld [vmem:[%s1625_s1 + $0x138] sm:$0xff]  }
   0xc   :  { %1072 = vmatpush3.bf16.msra.mxu0 %v1210_v10  ;;  %v1227_v27 = vld [vmem:[%s1625_s1 + $0x88] sm:$0xff]   ;;  %v1231_v32 = vld [vmem:[%s1625_s1 + $0x80] sm:$0xff]   ;;  %v1236_v49 = vld [vmem:[%s1625_s1 + $0x1b8] sm:$0xff]  }
   0xd   :  { %1094 = vmatpush3.bf16.msra.mxu1 %v1211_v11  ;;  %1073 = vmatprep.subr.bf16.mxu0 %v1212_v12  ;;  %v31_v34 = vld [vmem:[%s1624_s0] sm:$0xff]  ;;  %v1237_v52 = vld [vmem:[%s1625_s1 + $0x170] sm:$0xff]   ;;  %v1241_v58 = vld [vmem:[%s1625_s1 + $0x168] sm:$0xff]  }
   0xe   :  { %1095 = vmatprep.subr.bf16.mxu1 %v1213_v13  ;;  %v168_v39 = vcombine.high %v31_v34, %v31_v34  ;;  %v175_v42 = vrot.slane %v31_v34, %v1476_v41  ;;  %v1238_v54 = vld [vmem:[%s1625_s1 + $0x1f0] sm:$0xff]   ;;  %v1242_v59 = vld [vmem:[%s1625_s1 + $0x1e8] sm:$0xff]   ;;  %v1245_v62 = vld [vmem:[%s1625_s1 + $0x160] sm:$0xff]  }
   0xf   :  { %v1239_v55 = vld [vmem:[%s1625_s1 + $0x130] sm:$0xff]   ;;  %v1243_v60 = vld [vmem:[%s1625_s1 + $0x128] sm:$0xff]   ;;  %v1246_v63 = vld [vmem:[%s1625_s1 + $0x1e0] sm:$0xff]  }
  0x10   :  { %1074 = vmatpush3.bf16.msra.mxu0 %v1214_v14  ;;  %v1480_v43 = vrot.slane %v168_v39, %v1476_v41  ;;  %v183_v44 = vcombine.high %v175_v42, %v175_v42  ;;  %v191_v45 = vrot.slane %v175_v42, %v1476_v41  ;;  %v1240_v57 = vld [vmem:[%s1625_s1 + $0x1b0] sm:$0xff]   ;;  %v1244_v61 = vld [vmem:[%s1625_s1 + $0x1a8] sm:$0xff]   ;;  %v1247_v0 = vld [vmem:[%s1625_s1 + $0x120] sm:$0xff]  }
  0x11   :  { %1096 = vmatpush3.bf16.msra.mxu1 %v1215_v15  ;;  %1075 = vmatprep.subr.bf16.mxu0 %v1216_v16  ;;  %v1248_v1 = vld [vmem:[%s1625_s1 + $0x1a0] sm:$0xff]   ;;  %v1249_v2 = vld [vmem:[%s1625_s1 + $0x158] sm:$0xff]   ;;  %v1253_v6 = vld [vmem:[%s1625_s1 + $0x150] sm:$0xff]  }
  0x12   :  { %1097 = vmatprep.subr.bf16.mxu1 %v1217_v17  ;;  %v184_v46 = vcombine.high %v1480_v43, %v1480_v43  ;;  %v205_v48 = vrot.slane %v183_v44, %v1476_v41  ;;  %v213_v51 = vcombine.high %v191_v45, %v191_v45  ;;  %v1250_v3 = vld [vmem:[%s1625_s1 + $0x1d8] sm:$0xff]   ;;  %v1254_v7 = vld [vmem:[%s1625_s1 + $0x1d0] sm:$0xff]   ;;  %v1257_v10 = vld [vmem:[%s1625_s1 + $0x148] sm:$0xff]  }
  0x13   :  { %v1251_v4 = vld [vmem:[%s1625_s1 + $0x118] sm:$0xff]   ;;  %v1255_v8 = vld [vmem:[%s1625_s1 + $0x110] sm:$0xff]   ;;  %v1258_v11 = vld [vmem:[%s1625_s1 + $0x1c8] sm:$0xff]  }
  0x14   :  { %1076 = vmatpush3.bf16.msra.mxu0 %v1218_v18  ;;  %v212_v50 = vrot.slane %v184_v46, %v1476_v41  ;;  %641 = vmatprep.mubr.bf16.mxu0 %v205_v48  ;;  %v215_v53 = vcombine.high %v205_v48, %v205_v48  ;;  %v1252_v5 = vld [vmem:[%s1625_s1 + $0x198] sm:$0xff]   ;;  %v1256_v9 = vld [vmem:[%s1625_s1 + $0x190] sm:$0xff]   ;;  %v1259_v12 = vld [vmem:[%s1625_s1 + $0x108] sm:$0xff]  }
  0x15   :  { %1098 = vmatpush3.bf16.msra.mxu1 %v1219_v19  ;;  %1077 = vmatprep.subr.bf16.mxu0 %v1220_v20  ;;  %v1261_v13 = vld [vmem:[%s1625_s1 + $0x140] sm:$0xff]   ;;  %v1260_v14 = vld [vmem:[%s1625_s1 + $0x188] sm:$0xff]  }
  0x16   :  { %1099 = vmatprep.subr.bf16.mxu1 %v1221_v21  ;;  %v216_v56 = vcombine.high %v212_v50, %v212_v50  ;;  %681 = vmatprep.mubr.bf16.mxu1 %v215_v53  ;;  %v1262_v15 = vld [vmem:[%s1625_s1 + $0x1c0] sm:$0xff]  }
  0x17   :  { %v1263_v16 = vld [vmem:[%s1625_s1 + $0x100] sm:$0xff]  }
  0x18   :  { %1078 = vmatpush3.bf16.msra.mxu0 %v1222_v22 }
  0x19   :  { %1100 = vmatpush3.bf16.msra.mxu1 %v1223_v23  ;;  %1079 = vmatprep.subr.bf16.mxu0 %v1224_v24 }
  0x1a   :  { %1101 = vmatprep.subr.bf16.mxu1 %v1225_v25 }
  0x1c   :  { %1080 = vmatpush3.bf16.msra.mxu0 %v1226_v26 }
  0x1d   :  { %1102 = vmatpush3.bf16.msra.mxu1 %v1227_v27  ;;  %1081 = vmatprep.subr.bf16.mxu0 %v1228_v29 }
  0x1e   :  { %1103 = vmatprep.subr.bf16.mxu1 %v1229_v30 }
  0x20   :  { %1082 = vmatpush3.bf16.msra.mxu0 %v1230_v31 }
  0x21   :  { %1104 = vmatpush3.bf16.msra.mxu1 %v1231_v32  ;;  %1111 = vmatprep.subr.bf16.mxu0 %v1233_v35 }
  0x22   :  { %1133 = vmatprep.subr.bf16.mxu1 %v1234_v38 }
  0x23   :  { %642 = vmatmul.mubr.bf16.vlgmr.msra.gmra.mxu0 %v191_v45 }
  0x24   :  { %1112 = vmatpush3.bf16.msra.mxu0 %v1235_v47  ;;  %682 = vmatmul.mubr.bf16.vlgmr.msra.gmra.mxu1 %v213_v51 }
  0x25   :  { %1113 = vmatprep.subr.bf16.mxu0 %v1237_v52  ;;  %1134 = vmatpush3.bf16.msra.mxu1 %v1236_v49 }
  0x26   :  { %721 = vmatprep.mubr.bf16.mxu0 %v212_v50  ;;  %1135 = vmatprep.subr.bf16.mxu1 %v1238_v54 }
  0x27   :  { %761 = vmatprep.mubr.bf16.mxu1 %v216_v56 }
  0x28   :  { %1114 = vmatpush3.bf16.msra.mxu0 %v1239_v55 }
  0x29   :  { %1115 = vmatprep.subr.bf16.mxu0 %v1241_v58  ;;  %1136 = vmatpush3.bf16.msra.mxu1 %v1240_v57 }
  0x2a   :  { %1137 = vmatprep.subr.bf16.mxu1 %v1242_v59 }
  0x2c   :  { %1116 = vmatpush3.bf16.msra.mxu0 %v1243_v60 }
  0x2d   :  { %1117 = vmatprep.subr.bf16.mxu0 %v1245_v62  ;;  %1138 = vmatpush3.bf16.msra.mxu1 %v1244_v61 }
  0x2e   :  { %1139 = vmatprep.subr.bf16.mxu1 %v1246_v63 }
  0x30   :  { %1118 = vmatpush3.bf16.msra.mxu0 %v1247_v0 }
  0x31   :  { %1119 = vmatprep.subr.bf16.mxu0 %v1249_v2  ;;  %1140 = vmatpush3.bf16.msra.mxu1 %v1248_v1 }
  0x32   :  { %1141 = vmatprep.subr.bf16.mxu1 %v1250_v3 }
  0x34   :  { %1120 = vmatpush3.bf16.msra.mxu0 %v1251_v4 }
  0x35   :  { %1121 = vmatprep.subr.bf16.mxu0 %v1253_v6  ;;  %1142 = vmatpush3.bf16.msra.mxu1 %v1252_v5 }
  0x36   :  { %1143 = vmatprep.subr.bf16.mxu1 %v1254_v7 }
  0x38   :  { %1122 = vmatpush3.bf16.msra.mxu0 %v1255_v8 }
  0x39   :  { %1123 = vmatprep.subr.bf16.mxu0 %v1257_v10  ;;  %1144 = vmatpush3.bf16.msra.mxu1 %v1256_v9 }
  0x3a   :  { %1145 = vmatprep.subr.bf16.mxu1 %v1258_v11 }
  0x3c   :  { %1124 = vmatpush3.bf16.msra.mxu0 %v1259_v12 }
  0x3d   :  { %15 = vsyncpa [#allocation5], 0  ;;  %1125 = vmatprep.subr.bf16.mxu0 %v1261_v13  ;;  %v198_v17 = vrot.slane %v1480_v43, %v1476_v41  ;;  %1146 = vmatpush3.bf16.msra.mxu1 %v1260_v14  ;;  %v1264_v18 = vld [vmem:[%s1625_s1 + $0x180] sm:$0xff]   ;;  %v1265_v20 = vld [vmem:[%s1627_s3 + $0x8] sm:$0xff]   ;;  %v1322_v21 = vmov 0.0   ;;  %vm1323_vm0 = vmmov 0  }
  0x3e   :  { %1147 = vmatprep.subr.bf16.mxu1 %v1262_v15  ;;  %v1266_v22 = vld [vmem:[%s1627_s3] sm:$0xff]   ;;  %v1267_v23 = vld [vmem:[%s1629_s5 + $0x38] sm:$0xff]   ;;  %v1268_v24 = vld [vmem:[%s1629_s5 + $0x30] sm:$0xff]   ;;  %vm794_vm1 = vcmask 261120   ;;  %vm953_vm2 = vcmask 1041408  }
  0x3f   :  { %v214_v19 = vcombine.high %v198_v17, %v198_v17  ;;  %v1269_v25 = vld [vmem:[%s1629_s5 + $0x28] sm:$0xff]   ;;  %v1270_v26 = vld [vmem:[%s1629_s5 + $0x20] sm:$0xff]   ;;  %v1271_v27 = vld [vmem:[%s1629_s5 + $0x18] sm:$0xff]  }
  0x40   :  { %1126 = vmatpush3.bf16.msra.mxu0 %v1263_v16  ;;  %v1272_v28 = vld [vmem:[%s1629_s5 + $0x10] sm:$0xff]   ;;  %v989_v38 = vld [vmem:[%s1626_s2] ss:$0 sm:$0xff]  ;;  %v1273_v56 = vld [vmem:[%s1629_s5 + $0x8] sm:$0xff]  }
  0x41   :  { %1148 = vmatpush3.bf16.msra.mxu1 %v1264_v18  ;;  %1167 = vmatprep.subr.bf16.mxu0 %v1322_v21  ;;  %v1274_v57 = vld [vmem:[%s1629_s5] sm:$0xff]   ;;  %s1324_s5 = smov [#allocation2]  }
  0x42   :  { %1175 = vmatprep.subr.bf16.mxu1 %v1322_v21  ;;  %v1054_v58 = vld [vmem:[%s1628_s4] ss:$0 sm:$0xff]  ;;  %s967_s20 = sshll.u32 %s1324_s5, 4  ;;  %s968_s20 = int_to_ptr.vmem [resolvable:$true] %s967_s20 }
  0x43   :  { %722 = vmatmul.mubr.bf16.vlgmr.msra.gmra.mxu0 %v198_v17  ;;  %s1277_s4 = scalar_lea.vmem %s968_s20, 32  ;;  %p1282_p1 = scmp.lt.s32.totalorder %s968_s20, %s968_s20 }
  0x44   :  { %762 = vmatmul.mubr.bf16.vlgmr.msra.gmra.mxu1 %v214_v19  ;;  %1168 = vmatpush3.bf16.msra.mxu0 %v1265_v20  ;;  %p1278_p0 = scmp.ne.s32.totalorder %s968_s20, %s1277_s4  ;;  %p1283_p2 = scmp.lt.s32.totalorder %s1277_s4, %s1277_s4 }
  0x45   :  { %1169 = vmatprep.subr.bf16.mxu0 %v1322_v21  ;;  %1171 = vmatprep.mubr.msk.bf16.mxu0 %vm1323_vm0, %v1322_v21 }
  0x46   :  { %1191 = vmatprep.mubr.msk.bf16.mxu1 %vm1323_vm0, %v1322_v21  ;;  %1176 = vmatpush3.bf16.msra.mxu1 %v1267_v23  ;;  %p1284_p3 = por %p1283_p2, %p1282_p1 }
  0x47   :  { %1177 = vmatprep.subr.bf16.mxu1 %v1322_v21 }
  0x48   :  { %1170 = vmatpush3.bf16.msra.mxu0 %v1266_v22  ;;  %p1285_p4 = pnand %p1284_p3, %p1278_p0 }
  0x4a   :  { %1178 = vmatpush3.bf16.msra.mxu1 %v1268_v24 }
  0x4b   :  { %1179 = vmatprep.subr.bf16.mxu1 %v1322_v21 }
  0x4e   :  { %1180 = vmatpush3.bf16.msra.mxu1 %v1269_v25 }
  0x4f   :  { %1181 = vmatprep.subr.bf16.mxu1 %v1322_v21 }
  0x52   :  { %1182 = vmatpush3.bf16.msra.mxu1 %v1270_v26 }
  0x53   :  { %1183 = vmatprep.subr.bf16.mxu1 %v1322_v21 }
  0x56   :  { %1184 = vmatpush3.bf16.msra.mxu1 %v1271_v27 }
  0x57   :  { %1185 = vmatprep.subr.bf16.mxu1 %v1322_v21 }
  0x5a   :  { %1186 = vmatpush3.bf16.msra.mxu1 %v1272_v28 }
  0x5b   :  { %1187 = vmatprep.subr.bf16.mxu1 %v1322_v21 }
  0x5e   :  { %1188 = vmatpush3.bf16.msra.mxu1 %v1273_v56 }
  0x5f   :  { %1189 = vmatprep.subr.bf16.mxu1 %v1322_v21 }
  0x62   :  { %1190 = vmatpush3.bf16.msra.mxu1 %v1274_v57 }
  0xe3   :  { %v1083_v29 = vpop.f32.mrf.mxu0 }
  0xe4   :  { %v1105_v30 = vpop.f32.mrf.mxu1 }
  0xe5   :  { %v1084_v31 = vpop.f32.mrf.mxu0 }
  0xe6   :  { %v1106_v32 = vpop.f32.mrf.mxu1  ;;  %v1085_v37 = vadd.f32 %v1084_v31, %v1083_v29 }
  0xe7   :  { %v1086_v33 = vpop.f32.mrf.mxu0  ;;  %v1107_v40 = vadd.f32 %v1106_v32, %v1105_v30 }
  0xe8   :  { %v1108_v34 = vpop.f32.mrf.mxu1  ;;  %v644_v39 = vadd.f32 %v1085_v37, %v989_v38 }
  0xe9   :  { %v1087_v35 = vpop.f32.mrf.mxu0 }
  0xea   :  { %v1109_v36 = vpop.f32.mrf.mxu1  ;;  %v684_v44 = vadd.f32 %v1107_v40, %v644_v39 }
 0x103   :  { %v1127_v41 = vpop.f32.mrf.mxu0 }
 0x104   :  { %v1149_v42 = vpop.f32.mrf.mxu1 }
 0x105   :  { %v1128_v43 = vpop.f32.mrf.mxu0 }
 0x106   :  { %v1129_v45 = vadd.f32 %v1128_v43, %v1127_v41  ;;  %v1150_v46 = vpop.f32.mrf.mxu1 }
 0x107   :  { %v1130_v47 = vpop.f32.mrf.mxu0  ;;  %v1151_v49 = vadd.f32 %v1150_v46, %v1149_v42 }
 0x108   :  { %v724_v48 = vadd.f32 %v1129_v45, %v684_v44  ;;  %v1152_v50 = vpop.f32.mrf.mxu1 }
 0x109   :  { %v1131_v51 = vpop.f32.mrf.mxu0 }
 0x10a   :  { %v764_v52 = vadd.f32 %v1151_v49, %v724_v48  ;;  %v1153_v53 = vpop.f32.mrf.mxu1 }
 0x10c   :  { %v769_v54 = vmax.f32 %v764_v52, 0.0 }
 0x10e   :  { %v770_v55 = vpack.c.bf16 %v769_v54, %v769_v54 }
 0x110   :  { %1172 = vmatmul.mubr.msk.bf16.vlgmr.msra.gmra.mxu0 %vm794_vm1, %v770_v55 }
 0x1d0   :  { %v832_v59 = vpop.f32.mrf.mxu0 }
 0x1d1   :  { %v833_v60 = vadd.f32 %v1054_v58, %v832_v59 }
 0x1d2   :  { %v1173_v61 = vpop.f32.mrf.mxu0 }
 0x1d3   :  { %v838_v62 = vmax.f32 %v833_v60, 0.0 }
 0x1d4   :  { %v835_v63 = vpop.f32.mrf.mxu0 }
 0x1d5   :  { %v839_v0 = vpack.c.bf16 %v838_v62, %v838_v62  ;;  %v952_v1 = vmul.f32 %v838_v62, %v838_v62 }
 0x1d6   :  { %v1174_v2 = vpop.f32.mrf.mxu0 }
 0x1d7   :  { %1192 = vmatmul.mubr.bf16.vlgmr.msra.gmra.mxu1 %v839_v0  ;;  %v954_v3 = vsel %vm953_vm2, %v952_v1, 0.0 }
 0x1d8   :  { %955 = vadd.xlane.f32.xlu0 %v954_v3 }
 0x261   :  { %v956_v4 = vpop.xlane.xlu0 %955 }
 0x262   :  { %v957_v5 = vmax.f32 %v956_v4, 1e-24 }
 0x264   :  { %1275 = vrsqrt.f32 %v957_v5 }
 0x271   :  { %v1276_v6 = vpop.eup %1275 }
 0x272   :  { %v959_v7 = vmul.f32 %v1276_v6, %v838_v62 }
 0x274   :  { %960 = vst [vmem:[#allocation2] sm:$0x3] %v959_v7 }
 0x275   :  { %1288 = shalt.err (!%p1285_p4)
}
 0x276   :  { %970 = dma.vmem_to_hbm [thread:$0]  %s968_s20, 32, %s1631_s7, [#allocation3]   ;;  %v1058_v8 = vld [vmem:[%s1630_s6] ss:$0 sm:$0xff] }
 0x277   :  { %s1325_s25 = smov [#allocation4]  }
 0x278   :  { %s977_s1 = sshll.u32 %s1325_s25, 4  ;;  %s978_s1 = int_to_ptr.vmem [resolvable:$true] %s977_s1 }
 0x279   :  { %s1297_s26 = scalar_lea.vmem %s978_s1, 32  ;;  %p1302_p6 = scmp.lt.s32.totalorder %s978_s1, %s978_s1 }
 0x27a   :  { %p1298_p5 = scmp.ne.s32.totalorder %s978_s1, %s1297_s26  ;;  %p1303_p7 = scmp.lt.s32.totalorder %s1297_s26, %s1297_s26 }
 0x27c   :  { %p1304_p8 = por %p1303_p7, %p1302_p6 }
 0x27e   :  { %p1305_p9 = pnand %p1304_p8, %p1298_p5 }
 0x297   :  { %v945_v9 = vpop.f32.mrf.mxu1 }
 0x298   :  { %v946_v10 = vadd.f32 %v1058_v8, %v945_v9 }
 0x299   :  { %v1193_v11 = vpop.f32.mrf.mxu1 }
 0x29a   :  { %951 = vst [vmem:[#allocation4] sm:$0x3] %v946_v10 }
 0x29b   :  { %v948_v12 = vpop.f32.mrf.mxu1 }
 0x29c   :  { %1308 = shalt.err (!%p1305_p9)
}
 0x29d   :  { %980 = dma.vmem_to_hbm [thread:$0]  %s978_s1, 32, %s1632_s8, [#allocation5]   ;;  %v1194_v13 = vpop.f32.mrf.mxu1 }
 0x29e   :  { %1317 = dma.done.wait [#allocation3], 32  }
 0x29f   :  { %1318 = vsyncadd [#allocation3], 4294967264 }
 0x2a0   :  { %1319 = dma.done.wait [#allocation5], 32  }
 0x2a1   :  { %1320 = vsyncadd [#allocation5], 4294967264 }
 0x2a2   :  { %987 = vsyncpa [#allocation3], 1 }
 0x2a3   :  { %988 = vsyncpa [#allocation5], 1 }

</bundles_post_ra>
